<compile_context>
chip_gen: v5e
topology: v5e:2x2
jax: 0.10.0
libtpu: 0.0.40
codegen_flags: <defaults>
</compile_context>

<pallas_src>
import functools

import jax
import jax.numpy as jnp
from jax.experimental import pallas as pl
from jax.experimental.pallas import tpu as pltpu

_MIB = 1024 * 1024


def _round_up(x, m):
    return (x + m - 1) // m * m


def _vmem_budget_bytes():
    """Usable VMEM budget per chip generation (~75% of physical for compiler
    headroom): ~48 MiB on v7x (64 MiB / TC), ~96 MiB on v5e/v6e (128 MiB)."""
    try:
        phys = int(pltpu.get_tpu_info().vmem_capacity_bytes)
    except Exception:  # conservative fallback (v7x per-TC VMEM)
        phys = 64 * _MIB
    return (phys * 3) // 4


# -----------------------------------------------------------------------------
# Kernels
# -----------------------------------------------------------------------------

def _ffn_resident_kernel(x_ref, w1_ref, b1_ref, w2_ref, b2_ref, o_ref, acc_ref,
                         *, tf, n_k):
    """Weight-resident variant.

    x_ref  : (tm, dmp)  compute dtype, one row tile per grid step
    w1_ref : (dmp, dfp) compute dtype, whole array resident in VMEM
    b1_ref : (1,  dfp)  f32, resident
    w2_ref : (dfp, dmp) compute dtype, resident
    b2_ref : (1,  dmp)  f32, resident
    o_ref  : (tm, dmp)  output dtype
    acc_ref: (tm, dmp)  f32 accumulator scratch
    """
    # Fold b2 into the accumulator init: epilogue is just a cast + store.
    acc_ref[...] = jnp.broadcast_to(b2_ref[...], acc_ref.shape)

    def step(off):
        # First linear on a d_ff slice (bounds the f32 `h` to (tm, tf) for v7x),
        # f32 MXU accumulation, bias + ReLU in f32.
        h = jnp.dot(x_ref[...], w1_ref[:, pl.ds(off, tf)],
                    preferred_element_type=jnp.float32)
        h = jnp.maximum(h + b1_ref[:, pl.ds(off, tf)], 0.0)
        # Second linear: accumulate this slice's contribution in f32.
        acc_ref[...] += jnp.dot(h.astype(w2_ref.dtype), w2_ref[pl.ds(off, tf), :],
                                preferred_element_type=jnp.float32)

    if n_k <= 8:
        for k in range(n_k):               # static, tile-aligned ref views
            step(k * tf)
    else:
        @pl.loop(0, n_k)
        def _(k):
            step(pl.multiple_of(k * tf, 128))

    o_ref[...] = acc_ref[...].astype(o_ref.dtype)


def _ffn_stream_kernel(x_ref, w1_ref, b1_ref, w2_ref, b2_ref, o_ref, acc_ref):
    """Streaming fallback: grid = (row tiles, d_ff slices); weight slices are
    re-streamed from HBM, x/out/acc stay resident across the d_ff axis."""
    k = pl.program_id(1)

    @pl.when(k == 0)
    def _():
        acc_ref[...] = jnp.broadcast_to(b2_ref[...], acc_ref.shape)

    h = jnp.dot(x_ref[...], w1_ref[...], preferred_element_type=jnp.float32)
    h = jnp.maximum(h + b1_ref[...], 0.0)
    acc_ref[...] += jnp.dot(h.astype(w2_ref.dtype), w2_ref[...],
                            preferred_element_type=jnp.float32)

    @pl.when(k == pl.num_programs(1) - 1)
    def _():
        o_ref[...] = acc_ref[...].astype(o_ref.dtype)


# -----------------------------------------------------------------------------
# Parameter prep (one-time, outside the hot path)
# -----------------------------------------------------------------------------

def prepare_ffn_params(w1, b1, w2, b2, *, compute_dtype=jnp.bfloat16, tf_max=512):
    """Transpose / pad / cast nn.Linear params once.

    w1: (d_ff, d_model), b1: (d_ff,), w2: (d_model, d_ff), b2: (d_model,)
    compute_dtype=bf16 is the production path; f32 is for validation only.
    """
    d_ff, d_model = w1.shape
    assert w2.shape == (d_model, d_ff)
    dmp = _round_up(d_model, 128)                 # lane-dense model dim
    tf = min(tf_max, _round_up(d_ff, 128))        # d_ff slice, multiple of 128
    dfp = _round_up(d_ff, tf)                     # padded d_ff, multiple of tf

    w1_t = jnp.zeros((dmp, dfp), compute_dtype)
    w1_t = w1_t.at[:d_model, :d_ff].set(w1.T.astype(compute_dtype))
    w2_t = jnp.zeros((dfp, dmp), compute_dtype)
    w2_t = w2_t.at[:d_ff, :d_model].set(w2.T.astype(compute_dtype))
    b1_p = jnp.zeros((1, dfp), jnp.float32).at[0, :d_ff].set(b1.astype(jnp.float32))
    b2_p = jnp.zeros((1, dmp), jnp.float32).at[0, :d_model].set(b2.astype(jnp.float32))

    return {
        "w1_t": w1_t, "b1": b1_p, "w2_t": w2_t, "b2": b2_p,
        "d_model": d_model, "d_ff": d_ff, "tf": tf,
        "compute_dtype": compute_dtype,
    }


# -----------------------------------------------------------------------------
# VMEM estimates & tile selection
# -----------------------------------------------------------------------------

def _resident_vmem_bytes(tm, dmp, dfp, tf, isz, osz):
    weights = (dmp * dfp + dfp * dmp) * isz            # resident, single copy
    biases = 8 * dfp * 4 + 8 * dmp * 4                 # sublane-padded f32
    xio = 2 * tm * dmp * isz + 2 * tm * dmp * osz      # double-buffered x / out tiles
    acc = tm * dmp * 4                                 # f32 accumulator scratch
    h = tm * tf * 4 + tm * tf * isz                    # f32 h + cast copy for 2nd dot
    return int(1.25 * (weights + biases + xio + acc + h))


def _stream_vmem_bytes(tm, dmp, tf, isz, osz):
    weights = 2 * (dmp * tf + tf * dmp) * isz          # double-buffered weight slices
    biases = 2 * (8 * tf * 4 + 8 * dmp * 4)
    xio = 2 * tm * dmp * isz + 2 * tm * dmp * osz
    acc = tm * dmp * 4
    h = tm * tf * 4 + tm * tf * isz
    return int(1.25 * (weights + biases + xio + acc + h))


def _choose_tm(M, cap):
    tm = min(_round_up(cap, 16), _round_up(M, 16))
    # Guarantee >= 2 balanced row tiles for medium/large M so the "parallel" row
    # axis keeps v7x's second TensorCore busy.
    if M > 512:
        tm = min(tm, _round_up(-(-M // 2), 16))
    return max(tm, 16)


# -----------------------------------------------------------------------------
# Wrapper
# -----------------------------------------------------------------------------

def poswise_ffn(x, params, *, tm_max=None, out_dtype=None, force_stream=False):
    """x: (batch, seq, d_model); params from prepare_ffn_params.

    tm_max=None -> auto (512 for the weight-resident path, 1024 for streaming).
    out_dtype   -> output dtype (default: x.dtype); pass bf16 to halve writeback.
    """
    batch, seq, d_model = x.shape
    assert d_model == params["d_model"]
    w1_t, b1, w2_t, b2 = params["w1_t"], params["b1"], params["w2_t"], params["b2"]
    cdt = params["compute_dtype"]
    tf = params["tf"]
    dmp, dfp = w1_t.shape
    n_k = dfp // tf

    out_dtype = jnp.dtype(x.dtype if out_dtype is None else out_dtype)
    isz = jnp.dtype(cdt).itemsize
    osz = out_dtype.itemsize

    M = batch * seq
    budget = _vmem_budget_bytes()
    vmem_limit = int(budget)

    def run(variant, tm):
        m_p = _round_up(M, tm)
        x2d = x.reshape(M, d_model).astype(cdt)
        x2d = jnp.pad(x2d, ((0, m_p - M), (0, dmp - d_model)))

        if variant == "resident":
            kern = functools.partial(_ffn_resident_kernel, tf=tf, n_k=n_k)
            grid = (m_p // tm,)
            in_specs = [
                pl.BlockSpec((tm, dmp), lambda i: (i, 0)),          # x row tile
                pl.BlockSpec(memory_space=pltpu.MemorySpace.VMEM),  # w1^T resident
                pl.BlockSpec(memory_space=pltpu.MemorySpace.VMEM),  # b1 resident
                pl.BlockSpec(memory_space=pltpu.MemorySpace.VMEM),  # w2^T resident
                pl.BlockSpec(memory_space=pltpu.MemorySpace.VMEM),  # b2 resident
            ]
            out_spec = pl.BlockSpec((tm, dmp), lambda i: (i, 0))
            dims = ("parallel",)
        else:
            kern = _ffn_stream_kernel
            grid = (m_p // tm, n_k)                                  # reduction axis last
            in_specs = [
                pl.BlockSpec((tm, dmp), lambda i, k: (i, 0)),        # x (resident over k)
                pl.BlockSpec((dmp, tf), lambda i, k: (0, k)),        # w1^T d_ff slice
                pl.BlockSpec((1, tf), lambda i, k: (0, k)),          # b1 slice (f32)
                pl.BlockSpec((tf, dmp), lambda i, k: (k, 0)),        # w2^T d_ff slice
                pl.BlockSpec((1, dmp), lambda i, k: (0, 0)),         # b2 (f32)
            ]
            out_spec = pl.BlockSpec((tm, dmp), lambda i, k: (i, 0))
            dims = ("parallel", "arbitrary")

        out2d = pl.pallas_call(
            kern,
            out_shape=jax.ShapeDtypeStruct((m_p, dmp), out_dtype),
            grid_spec=pltpu.PrefetchScalarGridSpec(
                num_scalar_prefetch=0,
                grid=grid,
                in_specs=in_specs,
                out_specs=out_spec,
                scratch_shapes=[pltpu.VMEM((tm, dmp), jnp.float32)],
            ),
            compiler_params=pltpu.CompilerParams(
                dimension_semantics=dims,
                vmem_limit_bytes=vmem_limit,
            ),
        )(x2d, w1_t, b1, w2_t, b2)
        return out2d[:M, :d_model].reshape(batch, seq, d_model)

    # ---- variant / row-tile selection --------------------------------------
    if not force_stream:
        tm_res = _choose_tm(M, 512 if tm_max is None else tm_max)
        while tm_res > 16 and _resident_vmem_bytes(tm_res, dmp, dfp, tf, isz, osz) > budget:
            tm_res = max(16, _round_up(tm_res // 2, 16))
        if _resident_vmem_bytes(tm_res, dmp, dfp, tf, isz, osz) <= budget:
            try:
                return run("resident", tm_res)
            except Exception:
                pass  # lowering issue on this backend -> fall back to streaming

    # Streaming: weights re-streamed per row tile, so use a larger row tile to push
    # per-slice arithmetic intensity past the HBM roofline crossover.
    tm_st = _choose_tm(M, 1024 if tm_max is None else tm_max)
    while tm_st > 16 and _stream_vmem_bytes(tm_st, dmp, tf, isz, osz) > budget:
        tm_st = max(16, _round_up(tm_st // 2, 16))
    return run("stream", tm_st)


# -----------------------------------------------------------------------------
# Reference + self-test
# -----------------------------------------------------------------------------

def _reference(x, w1, b1, w2, b2):
    h = jnp.maximum(jnp.einsum("bsd,fd->bsf", x, w1) + b1, 0.0)
    return jnp.einsum("bsf,df->bsd", h, w2) + b2


if __name__ == "__main__":
    # Shapes consistent with the module: x (batch, seq, d_model), w_1(d_model->d_ff).
    batch, seq, d_model, d_ff = 2, 8, 32, 64
    key = jax.random.PRNGKey(0)
    kx, kw1, kb1, kw2, kb2 = jax.random.split(key, 5)

    x = jax.random.normal(kx, (batch, seq, d_model), dtype=jnp.float32)
    w1 = jax.random.normal(kw1, (d_ff, d_model), dtype=jnp.float32) * 0.1
    b1 = jax.random.normal(kb1, (d_ff,), dtype=jnp.float32) * 0.1
    w2 = jax.random.normal(kw2, (d_model, d_ff), dtype=jnp.float32) * 0.1
    b2 = jax.random.normal(kb2, (d_model,), dtype=jnp.float32) * 0.1

    ref = _reference(x, w1, b1, w2, b2)

    # 1) f32 compute path (validation only): tight tolerance, resident kernel.
    p32 = prepare_ffn_params(w1, b1, w2, b2, compute_dtype=jnp.float32)
    out32 = jax.block_until_ready(poswise_ffn(x, p32))
    assert out32.shape == (batch, seq, d_model)
    assert jnp.allclose(out32, ref, atol=1e-4, rtol=1e-4), "f32 mismatch vs reference"

    # 2) bf16 compute path (production): loose tolerance.
    pbf = prepare_ffn_params(w1, b1, w2, b2, compute_dtype=jnp.bfloat16)
    outbf = jax.block_until_ready(poswise_ffn(x, pbf))
    assert jnp.allclose(outbf, ref, atol=5e-2, rtol=5e-2), "bf16 mismatch vs reference"

    # 2b) bf16 output (halves output HBM writeback).
    outbf16 = jax.block_until_ready(poswise_ffn(x, pbf, out_dtype=jnp.bfloat16))
    assert outbf16.dtype == jnp.bfloat16
    assert jnp.allclose(outbf16.astype(jnp.float32), ref, atol=1e-1, rtol=1e-1), \
        "bf16-output mismatch vs reference"

    # 3) Padding + multiple d_ff slices + multiple row tiles (resident path).
    b2_, s2_, dm2, df2 = 2, 24, 96, 1000
    k2 = jax.random.PRNGKey(1)
    kx2, kw12, kb12, kw22, kb22 = jax.random.split(k2, 5)
    x2 = jax.random.normal(kx2, (b2_, s2_, dm2), dtype=jnp.float32)
    w1b = jax.random.normal(kw12, (df2, dm2), dtype=jnp.float32) * 0.05
    b1b = jax.random.normal(kb12, (df2,), dtype=jnp.float32) * 0.05
    w2b = jax.random.normal(kw22, (dm2, df2), dtype=jnp.float32) * 0.05
    b2b = jax.random.normal(kb22, (dm2,), dtype=jnp.float32) * 0.05
    ref2 = _reference(x2, w1b, b1b, w2b, b2b)
    p2 = prepare_ffn_params(w1b, b1b, w2b, b2b, compute_dtype=jnp.bfloat16, tf_max=512)
    out2 = jax.block_until_ready(poswise_ffn(x2, p2, tm_max=32))
    assert out2.shape == (b2_, s2_, dm2)
    assert jnp.allclose(out2, ref2, atol=8e-2, rtol=8e-2), "resident multi-tile mismatch"

    # 4) Same shapes, forced streaming kernel (fallback path stays correct).
    out2s = jax.block_until_ready(poswise_ffn(x2, p2, tm_max=32, force_stream=True))
    assert jnp.allclose(out2s, ref2, atol=8e-2, rtol=8e-2), "streaming mismatch"

    # 5) M > 512: exercises the ">= 2 balanced row tiles" split (v7x megacore).
    b3_, s3_, dm3, df3 = 3, 200, 128, 256
    k3 = jax.random.PRNGKey(2)
    kx3, kw13, kb13, kw23, kb23 = jax.random.split(k3, 5)
    x3 = jax.random.normal(kx3, (b3_, s3_, dm3), dtype=jnp.float32)
    w1c = jax.random.normal(kw13, (df3, dm3), dtype=jnp.float32) * 0.05
    b1c = jax.random.normal(kb13, (df3,), dtype=jnp.float32) * 0.05
    w2c = jax.random.normal(kw23, (dm3, df3), dtype=jnp.float32) * 0.05
    b2c = jax.random.normal(kb23, (dm3,), dtype=jnp.float32) * 0.05
    ref3 = _reference(x3, w1c, b1c, w2c, b2c)
    p3 = prepare_ffn_params(w1c, b1c, w2c, b2c, compute_dtype=jnp.bfloat16)
    out3 = jax.block_until_ready(poswise_ffn(x3, p3))
    assert out3.shape == (b3_, s3_, dm3)
    assert jnp.allclose(out3, ref3, atol=8e-2, rtol=8e-2), "2-tile split mismatch"

    print("KERNEL_OK")
</pallas_src>

<mosaic_0001>
module attributes {stable_mosaic.version = 11 : i64} {
  func.func @_ffn_resident_kernel(%arg0: i32, %arg1: memref<16x128xf32, #tpu.memory_space<vmem>>, %arg2: memref<128x128xf32, #tpu.memory_space<vmem>>, %arg3: memref<1x128xf32, #tpu.memory_space<vmem>>, %arg4: memref<128x128xf32, #tpu.memory_space<vmem>>, %arg5: memref<1x128xf32, #tpu.memory_space<vmem>>, %arg6: memref<16x128xf32, #tpu.memory_space<vmem>>, %arg7: memref<16x128xf32, #tpu.memory_space<vmem>>) attributes {dimension_semantics = [#tpu.dimension_semantics<parallel>], iteration_bounds = array<i64: 1>, scalar_prefetch = 0 : i64, scratch_operands = 1 : i64, tpu.core_type = #tpu.core_type<tc>, window_params = [{transform_indices = @transform_0, window_bounds = array<i64: 16, 128>}, {pipeline_mode = #tpu.pipeline_mode<synchronous>, transform_indices = @transform_1, window_bounds = array<i64: 128, 128>}, {pipeline_mode = #tpu.pipeline_mode<synchronous>, transform_indices = @transform_2, window_bounds = array<i64: 1, 128>}, {pipeline_mode = #tpu.pipeline_mode<synchronous>, transform_indices = @transform_3, window_bounds = array<i64: 128, 128>}, {pipeline_mode = #tpu.pipeline_mode<synchronous>, transform_indices = @transform_4, window_bounds = array<i64: 1, 128>}, {transform_indices = @transform_5, window_bounds = array<i64: 16, 128>}]} {
    %c0 = arith.constant 0 : index
    %c0_0 = arith.constant 0 : index
    %0 = vector.load %arg5[%c0, %c0_0] : memref<1x128xf32, #tpu.memory_space<vmem>>, vector<1x128xf32>
    %1 = vector.shape_cast %0 : vector<1x128xf32> to vector<1x128xf32>
    %2 = vector.broadcast %1 : vector<1x128xf32> to vector<16x128xf32>
    %c0_1 = arith.constant 0 : index
    %c0_2 = arith.constant 0 : index
    %3 = vector.load %arg7[%c0_1, %c0_2] : memref<16x128xf32, #tpu.memory_space<vmem>>, vector<16x128xf32>
    tpu.vector_store %arg7[%c0_1, %c0_2], %2 {strides = array<i32>} : memref<16x128xf32, #tpu.memory_space<vmem>>, vector<16x128xf32>,
    %c0_3 = arith.constant 0 : index
    %c0_4 = arith.constant 0 : index
    %4 = vector.load %arg1[%c0_3, %c0_4] : memref<16x128xf32, #tpu.memory_space<vmem>>, vector<16x128xf32>
    %c0_5 = arith.constant 0 : index
    %c0_6 = arith.constant 0 : index
    %5 = vector.load %arg2[%c0_5, %c0_6] : memref<128x128xf32, #tpu.memory_space<vmem>>, vector<128x128xf32>
    %cst = arith.constant dense<0.000000e+00> : vector<16x128xf32>
    %6 = tpu.matmul %4, %5, %cst {dimension_numbers = #tpu.dot_dimension_numbers<[1], [0], [0], [1], [0, 0, 1, 1], [], []>} : vector<16x128xf32>, vector<128x128xf32>, vector<16x128xf32> -> vector<16x128xf32>
    %c0_7 = arith.constant 0 : index
    %c0_8 = arith.constant 0 : index
    %7 = vector.load %arg3[%c0_7, %c0_8] : memref<1x128xf32, #tpu.memory_space<vmem>>, vector<1x128xf32>
    %8 = vector.broadcast %7 : vector<1x128xf32> to vector<16x128xf32>
    %9 = arith.addf %6, %8 : vector<16x128xf32>
    %cst_9 = arith.constant 0.000000e+00 : f32
    %10 = vector.broadcast %cst_9 : f32 to vector<16x128xf32>
    %11 = arith.maximumf %9, %10 : vector<16x128xf32>
    %c0_10 = arith.constant 0 : index
    %c0_11 = arith.constant 0 : index
    %12 = vector.load %arg7[%c0_10, %c0_11] : memref<16x128xf32, #tpu.memory_space<vmem>>, vector<16x128xf32>
    %c0_12 = arith.constant 0 : index
    %c0_13 = arith.constant 0 : index
    %13 = vector.load %arg4[%c0_12, %c0_13] : memref<128x128xf32, #tpu.memory_space<vmem>>, vector<128x128xf32>
    %cst_14 = arith.constant dense<0.000000e+00> : vector<16x128xf32>
    %14 = tpu.matmul %11, %13, %cst_14 {dimension_numbers = #tpu.dot_dimension_numbers<[1], [0], [0], [1], [0, 0, 1, 1], [], []>} : vector<16x128xf32>, vector<128x128xf32>, vector<16x128xf32> -> vector<16x128xf32>
    %15 = arith.addf %12, %14 : vector<16x128xf32>
    %c0_15 = arith.constant 0 : index
    %c0_16 = arith.constant 0 : index
    %16 = vector.load %arg7[%c0_15, %c0_16] : memref<16x128xf32, #tpu.memory_space<vmem>>, vector<16x128xf32>
    tpu.vector_store %arg7[%c0_15, %c0_16], %15 {strides = array<i32>} : memref<16x128xf32, #tpu.memory_space<vmem>>, vector<16x128xf32>,
    %c0_17 = arith.constant 0 : index
    %c0_18 = arith.constant 0 : index
    %17 = vector.load %arg7[%c0_17, %c0_18] : memref<16x128xf32, #tpu.memory_space<vmem>>, vector<16x128xf32>
    %c0_19 = arith.constant 0 : index
    %c0_20 = arith.constant 0 : index
    %18 = vector.load %arg6[%c0_19, %c0_20] : memref<16x128xf32, #tpu.memory_space<vmem>>, vector<16x128xf32>
    tpu.vector_store %arg6[%c0_19, %c0_20], %17 {strides = array<i32>} : memref<16x128xf32, #tpu.memory_space<vmem>>, vector<16x128xf32>,
    return
  }
  func.func @transform_0(%arg0: i32) -> (i32, i32) {
    %c0_i32 = arith.constant 0 : i32
    %c0_i32_0 = arith.constant 0 : i32
    return %arg0, %c0_i32 : i32, i32
  }
  func.func @transform_1(%arg0: i32) -> (i32, i32) {
    %c0_i32 = arith.constant 0 : i32
    %c0_i32_0 = arith.constant 0 : i32
    %c0_i32_1 = arith.constant 0 : i32
    return %c0_i32, %c0_i32_0 : i32, i32
  }
  func.func @transform_2(%arg0: i32) -> (i32, i32) {
    %c0_i32 = arith.constant 0 : i32
    %c0_i32_0 = arith.constant 0 : i32
    %c0_i32_1 = arith.constant 0 : i32
    return %c0_i32, %c0_i32_0 : i32, i32
  }
  func.func @transform_3(%arg0: i32) -> (i32, i32) {
    %c0_i32 = arith.constant 0 : i32
    %c0_i32_0 = arith.constant 0 : i32
    %c0_i32_1 = arith.constant 0 : i32
    return %c0_i32, %c0_i32_0 : i32, i32
  }
  func.func @transform_4(%arg0: i32) -> (i32, i32) {
    %c0_i32 = arith.constant 0 : i32
    %c0_i32_0 = arith.constant 0 : i32
    %c0_i32_1 = arith.constant 0 : i32
    return %c0_i32, %c0_i32_0 : i32, i32
  }
  func.func @transform_5(%arg0: i32) -> (i32, i32) {
    %c0_i32 = arith.constant 0 : i32
    %c0_i32_0 = arith.constant 0 : i32
    return %arg0, %c0_i32 : i32, i32
  }
}

module attributes {stable_mosaic.version = 11 : i64} {
  func.func @_ffn_stream_kernel(%arg0: i32, %arg1: i32, %arg2: memref<16x128xf32, #tpu.memory_space<vmem>>, %arg3: memref<128x128xf32, #tpu.memory_space<vmem>>, %arg4: memref<1x128xf32, #tpu.memory_space<vmem>>, %arg5: memref<128x128xf32, #tpu.memory_space<vmem>>, %arg6: memref<1x128xf32, #tpu.memory_space<vmem>>, %arg7: memref<16x128xf32, #tpu.memory_space<vmem>>, %arg8: memref<16x128xf32, #tpu.memory_space<vmem>>) attributes {dimension_semantics = [#tpu.dimension_semantics<parallel>, #tpu.dimension_semantics<arbitrary>], iteration_bounds = array<i64: 1, 1>, scalar_prefetch = 0 : i64, scratch_operands = 1 : i64, tpu.core_type = #tpu.core_type<tc>, window_params = [{transform_indices = @transform_0, window_bounds = array<i64: 16, 128>}, {transform_indices = @transform_1, window_bounds = array<i64: 128, 128>}, {transform_indices = @transform_2, window_bounds = array<i64: 1, 128>}, {transform_indices = @transform_3, window_bounds = array<i64: 128, 128>}, {pipeline_mode = #tpu.pipeline_mode<synchronous>, transform_indices = @transform_4, window_bounds = array<i64: 1, 128>}, {transform_indices = @transform_5, window_bounds = array<i64: 16, 128>}]} {
    %c0_i32 = arith.constant 0 : i32
    %0 = arith.cmpi eq, %arg1, %c0_i32 : i32
    %1 = arith.extui %0 : i1 to i32
    %c0_i32_0 = arith.constant 0 : i32
    %2 = arith.cmpi ne, %1, %c0_i32_0 : i32
    scf.if %2 {
      %c0_16 = arith.constant 0 : index
      %c0_17 = arith.constant 0 : index
      %19 = vector.load %arg6[%c0_16, %c0_17] : memref<1x128xf32, #tpu.memory_space<vmem>>, vector<1x128xf32>
      %20 = vector.shape_cast %19 : vector<1x128xf32> to vector<1x128xf32>
      %21 = vector.broadcast %20 : vector<1x128xf32> to vector<16x128xf32>
      %c0_18 = arith.constant 0 : index
      %c0_19 = arith.constant 0 : index
      %22 = vector.load %arg8[%c0_18, %c0_19] : memref<16x128xf32, #tpu.memory_space<vmem>>, vector<16x128xf32>
      tpu.vector_store %arg8[%c0_18, %c0_19], %21 {strides = array<i32>} : memref<16x128xf32, #tpu.memory_space<vmem>>, vector<16x128xf32>,
    } else {
    }
    %c0 = arith.constant 0 : index
    %c0_1 = arith.constant 0 : index
    %3 = vector.load %arg2[%c0, %c0_1] : memref<16x128xf32, #tpu.memory_space<vmem>>, vector<16x128xf32>
    %c0_2 = arith.constant 0 : index
    %c0_3 = arith.constant 0 : index
    %4 = vector.load %arg3[%c0_2, %c0_3] : memref<128x128xf32, #tpu.memory_space<vmem>>, vector<128x128xf32>
    %cst = arith.constant dense<0.000000e+00> : vector<16x128xf32>
    %5 = tpu.matmul %3, %4, %cst {dimension_numbers = #tpu.dot_dimension_numbers<[1], [0], [0], [1], [0, 0, 1, 1], [], []>} : vector<16x128xf32>, vector<128x128xf32>, vector<16x128xf32> -> vector<16x128xf32>
    %c0_4 = arith.constant 0 : index
    %c0_5 = arith.constant 0 : index
    %6 = vector.load %arg4[%c0_4, %c0_5] : memref<1x128xf32, #tpu.memory_space<vmem>>, vector<1x128xf32>
    %7 = vector.broadcast %6 : vector<1x128xf32> to vector<16x128xf32>
    %8 = arith.addf %5, %7 : vector<16x128xf32>
    %cst_6 = arith.constant 0.000000e+00 : f32
    %9 = vector.broadcast %cst_6 : f32 to vector<16x128xf32>
    %10 = arith.maximumf %8, %9 : vector<16x128xf32>
    %c0_7 = arith.constant 0 : index
    %c0_8 = arith.constant 0 : index
    %11 = vector.load %arg8[%c0_7, %c0_8] : memref<16x128xf32, #tpu.memory_space<vmem>>, vector<16x128xf32>
    %c0_9 = arith.constant 0 : index
    %c0_10 = arith.constant 0 : index
    %12 = vector.load %arg5[%c0_9, %c0_10] : memref<128x128xf32, #tpu.memory_space<vmem>>, vector<128x128xf32>
    %cst_11 = arith.constant dense<0.000000e+00> : vector<16x128xf32>
    %13 = tpu.matmul %10, %12, %cst_11 {dimension_numbers = #tpu.dot_dimension_numbers<[1], [0], [0], [1], [0, 0, 1, 1], [], []>} : vector<16x128xf32>, vector<128x128xf32>, vector<16x128xf32> -> vector<16x128xf32>
    %14 = arith.addf %11, %13 : vector<16x128xf32>
    %c0_12 = arith.constant 0 : index
    %c0_13 = arith.constant 0 : index
    %15 = vector.load %arg8[%c0_12, %c0_13] : memref<16x128xf32, #tpu.memory_space<vmem>>, vector<16x128xf32>
    tpu.vector_store %arg8[%c0_12, %c0_13], %14 {strides = array<i32>} : memref<16x128xf32, #tpu.memory_space<vmem>>, vector<16x128xf32>,
    %c0_i32_14 = arith.constant 0 : i32
    %16 = arith.cmpi eq, %arg1, %c0_i32_14 : i32
    %17 = arith.extui %16 : i1 to i32
    %c0_i32_15 = arith.constant 0 : i32
    %18 = arith.cmpi ne, %17, %c0_i32_15 : i32
    scf.if %18 {
      %c0_16 = arith.constant 0 : index
      %c0_17 = arith.constant 0 : index
      %19 = vector.load %arg8[%c0_16, %c0_17] : memref<16x128xf32, #tpu.memory_space<vmem>>, vector<16x128xf32>
      %c0_18 = arith.constant 0 : index
      %c0_19 = arith.constant 0 : index
      %20 = vector.load %arg7[%c0_18, %c0_19] : memref<16x128xf32, #tpu.memory_space<vmem>>, vector<16x128xf32>
      tpu.vector_store %arg7[%c0_18, %c0_19], %19 {strides = array<i32>} : memref<16x128xf32, #tpu.memory_space<vmem>>, vector<16x128xf32>,
    } else {
    }
    return
  }
  func.func @transform_0(%arg0: i32, %arg1: i32) -> (i32, i32) {
    %c0_i32 = arith.constant 0 : i32
    %c0_i32_0 = arith.constant 0 : i32
    return %arg0, %c0_i32 : i32, i32
  }
  func.func @transform_1(%arg0: i32, %arg1: i32) -> (i32, i32) {
    %c0_i32 = arith.constant 0 : i32
    %c0_i32_0 = arith.constant 0 : i32
    return %c0_i32, %arg1 : i32, i32
  }
  func.func @transform_2(%arg0: i32, %arg1: i32) -> (i32, i32) {
    %c0_i32 = arith.constant 0 : i32
    %c0_i32_0 = arith.constant 0 : i32
    return %c0_i32, %arg1 : i32, i32
  }
  func.func @transform_3(%arg0: i32, %arg1: i32) -> (i32, i32) {
    %c0_i32 = arith.constant 0 : i32
    %c0_i32_0 = arith.constant 0 : i32
    return %arg1, %c0_i32 : i32, i32
  }
  func.func @transform_4(%arg0: i32, %arg1: i32) -> (i32, i32) {
    %c0_i32 = arith.constant 0 : i32
    %c0_i32_0 = arith.constant 0 : i32
    %c0_i32_1 = arith.constant 0 : i32
    return %c0_i32, %c0_i32_0 : i32, i32
  }
  func.func @transform_5(%arg0: i32, %arg1: i32) -> (i32, i32) {
    %c0_i32 = arith.constant 0 : i32
    %c0_i32_0 = arith.constant 0 : i32
    return %arg0, %c0_i32 : i32, i32
  }
}

</mosaic_0001>

<bundles_post_ra>
// kernel: tpu_custom_call.1
= control target key start
LH: loop header
LB: loop body
LE: loop exit
PB: predicated region body
PF: predicated region fallthrough
CT: control target
= control target key end

     0   :  { %10 = vsyncpa [#allocation4], 0  ;;  %s398_s0 = inlined_call_operand.hbm [shape: f32[16,128], index: 0, kind: input, shape index: {}]   ;;  %s399_s1 = inlined_call_operand.hbm [shape: f32[128,128], index: 1, kind: input, shape index: {}]   ;;  %s400_s2 = inlined_call_operand.vmem [shape: f32[1,128], index: 2, kind: input, shape index: {}]   ;;  %s401_s3 = inlined_call_operand.hbm [shape: f32[128,128], index: 3, kind: input, shape index: {}]   ;;  %s402_s4 = inlined_call_operand.vmem [shape: f32[1,128], index: 4, kind: input, shape index: {}]   ;;  %s403_s5 = inlined_call_operand.hbm [shape: f32[16,128], index: 5, kind: output, shape index: {}]  }
   0x1   :  { %11 = vsyncpa [#allocation7], 0 }
   0x2   :  { %12 = vsyncpa [#allocation5], 0  ;;  %s30_s20 = sshll.u32 %s399_s1, 4  ;;  %s332_s21 = smov [#allocation6]   ;;  %s31_s20 = int_to_ptr.hbm [resolvable:$true] %s30_s20 }
   0x3   :  { %s32_s22 = sshll.u32 %s332_s21, 4  ;;  %s17_s25 = sshll.u32 %s398_s0, 4  ;;  %s33_s22 = int_to_ptr.vmem [resolvable:$true] %s32_s22  ;;  %s18_s25 = int_to_ptr.hbm [resolvable:$true] %s17_s25 }
   0x4   :  { %s333_s26 = smov 128   ;;  %s334_s27 = smov 8  }
   0x5   :  { %38 = dma.hbm_to_vmem [thread:$0]  %s31_s20, 2048, %s33_s22, [#allocation7], %s333_s26, %s333_s26, %s334_s27  }
   0x6   :  { %s335_s28 = smov [#allocation3]   ;;  %s45_s1 = sshll.u32 %s401_s3, 4  ;;  %s46_s1 = int_to_ptr.hbm [resolvable:$true] %s45_s1 }
   0x7   :  { %s19_s29 = sshll.u32 %s335_s28, 4  ;;  %s336_s0 = smov [#allocation8]   ;;  %s20_s29 = int_to_ptr.vmem [resolvable:$true] %s19_s29 }
   0x8   :  { %25 = dma.hbm_to_vmem [thread:$0]  %s18_s25, 256, %s20_s29, [#allocation4], %s333_s26, %s333_s26, %s334_s27  }
   0x9   :  { %s47_s7 = sshll.u32 %s336_s0, 4  ;;  %s48_s7 = int_to_ptr.vmem [resolvable:$true] %s47_s7 }
   0xa   :  { %53 = dma.hbm_to_vmem [thread:$0]  %s46_s1, 2048, %s48_s7, [#allocation7], %s333_s26, %s333_s26, %s334_s27  }
   0xb   :  { %326 = dma.done.wait [#allocation4], 256  }
   0xc   :  { %327 = vsyncadd [#allocation4], 4294967040 }
   0xd   :  { %328 = dma.done.wait [#allocation7], 4096  }
   0xe   :  { %329 = vsyncadd [#allocation7], 4294963200  ;;  %v91_v0 = vld [vmem:[#allocation6 + $0x78] sm:$0xff]  ;;  %v90_v1 = vld [vmem:[#allocation6 + $0x70] sm:$0xff]  ;;  %s337_s11 = smov [#allocation9]  }
   0xf   :  { %190 = vmatpush.msra.mxu2 %v91_v0  ;;  %96 = vmatpush.msra.mxu0 %v91_v0  ;;  %v89_v2 = vld [vmem:[#allocation6 + $0x68] sm:$0xff]  ;;  %v88_v3 = vld [vmem:[#allocation6 + $0x60] sm:$0xff]  ;;  %v87_v4 = vld [vmem:[#allocation6 + $0x58] sm:$0xff]  ;;  %s174_s12 = sshll.u32 %s337_s11, 4  ;;  %s175_s12 = int_to_ptr.vmem [resolvable:$true] %s174_s12 }
  0x10   :  { %v138_v5 = vld [vmem:[#allocation8 + $0x78] sm:$0xff]  ;;  %v137_v6 = vld [vmem:[#allocation8 + $0x70] sm:$0xff]  ;;  %v136_v8 = vld [vmem:[#allocation8 + $0x68] sm:$0xff] }
  0x11   :  { %191 = vmatpush.msra.mxu2 %v90_v1  ;;  %97 = vmatpush.msra.mxu0 %v90_v1  ;;  %v86_v7 = vld [vmem:[#allocation6 + $0x50] sm:$0xff]  ;;  %v85_v9 = vld [vmem:[#allocation6 + $0x48] sm:$0xff]  ;;  %v135_v10 = vld [vmem:[#allocation8 + $0x60] sm:$0xff] }
  0x12   :  { %206 = vmatpush.msra.mxu3 %v138_v5  ;;  %139 = vmatpush.msra.mxu1 %v138_v5  ;;  %v84_v11 = vld [vmem:[#allocation6 + $0x40] sm:$0xff]  ;;  %v134_v12 = vld [vmem:[#allocation8 + $0x58] sm:$0xff]  ;;  %v133_v14 = vld [vmem:[#allocation8 + $0x50] sm:$0xff] }
  0x13   :  { %192 = vmatpush.msra.mxu2 %v89_v2  ;;  %98 = vmatpush.msra.mxu0 %v89_v2  ;;  %v83_v13 = vld [vmem:[#allocation6 + $0x38] sm:$0xff]  ;;  %v82_v15 = vld [vmem:[#allocation6 + $0x30] sm:$0xff]  ;;  %v132_v16 = vld [vmem:[#allocation8 + $0x48] sm:$0xff] }
  0x14   :  { %207 = vmatpush.msra.mxu3 %v137_v6  ;;  %140 = vmatpush.msra.mxu1 %v137_v6  ;;  %v81_v17 = vld [vmem:[#allocation6 + $0x28] sm:$0xff]  ;;  %v131_v18 = vld [vmem:[#allocation8 + $0x40] sm:$0xff]  ;;  %v130_v20 = vld [vmem:[#allocation8 + $0x38] sm:$0xff] }
  0x15   :  { %193 = vmatpush.msra.mxu2 %v88_v3  ;;  %99 = vmatpush.msra.mxu0 %v88_v3  ;;  %v80_v19 = vld [vmem:[#allocation6 + $0x20] sm:$0xff]  ;;  %v79_v21 = vld [vmem:[#allocation6 + $0x18] sm:$0xff]  ;;  %v129_v22 = vld [vmem:[#allocation8 + $0x30] sm:$0xff] }
  0x16   :  { %208 = vmatpush.msra.mxu3 %v136_v8  ;;  %141 = vmatpush.msra.mxu1 %v136_v8  ;;  %v78_v23 = vld [vmem:[#allocation6 + $0x10] sm:$0xff]  ;;  %v128_v24 = vld [vmem:[#allocation8 + $0x28] sm:$0xff]  ;;  %v127_v26 = vld [vmem:[#allocation8 + $0x20] sm:$0xff] }
  0x17   :  { %194 = vmatpush.msra.mxu2 %v87_v4  ;;  %100 = vmatpush.msra.mxu0 %v87_v4  ;;  %v77_v25 = vld [vmem:[#allocation6 + $0x8] sm:$0xff]  ;;  %v76_v27 = vld [vmem:[#allocation6] sm:$0xff]  ;;  %v75_v28 = vld [vmem:[#allocation3 + $0x8] sm:$0xff] }
  0x18   :  { %209 = vmatpush.msra.mxu3 %v135_v10  ;;  %142 = vmatpush.msra.mxu1 %v135_v10  ;;  %v74_v29 = vld [vmem:[#allocation3] sm:$0xff]  ;;  %v126_v30 = vld [vmem:[#allocation8 + $0x18] sm:$0xff]  ;;  %v124_v32 = vld [vmem:[#allocation8 + $0x8] sm:$0xff] }
  0x19   :  { %195 = vmatpush.msra.mxu2 %v86_v7  ;;  %101 = vmatpush.msra.mxu0 %v86_v7  ;;  %v125_v31 = vld [vmem:[#allocation8 + $0x10] sm:$0xff]  ;;  %v123_v33 = vld [vmem:[#allocation8] sm:$0xff] }
  0x1a   :  { %210 = vmatpush.msra.mxu3 %v134_v12  ;;  %143 = vmatpush.msra.mxu1 %v134_v12  ;;  %v228_v34 = vld [vmem:[%s400_s2] ss:$0 sm:$0xff]  ;;  %s176_s2 = sshll.u32 %s403_s5, 4  ;;  %s177_s2 = int_to_ptr.hbm [resolvable:$true] %s176_s2 }
  0x1b   :  { %196 = vmatpush.msra.mxu2 %v85_v9  ;;  %102 = vmatpush.msra.mxu0 %v85_v9  ;;  %v229_v41 = vld [vmem:[%s402_s4] ss:$0 sm:$0xff] }
  0x1c   :  { %211 = vmatpush.msra.mxu3 %v133_v14  ;;  %144 = vmatpush.msra.mxu1 %v133_v14 }
  0x1d   :  { %197 = vmatpush.msra.mxu2 %v84_v11  ;;  %103 = vmatpush.msra.mxu0 %v84_v11 }
  0x1e   :  { %212 = vmatpush.msra.mxu3 %v132_v16  ;;  %145 = vmatpush.msra.mxu1 %v132_v16 }
  0x1f   :  { %198 = vmatpush.msra.mxu2 %v83_v13  ;;  %104 = vmatpush.msra.mxu0 %v83_v13 }
  0x20   :  { %213 = vmatpush.msra.mxu3 %v131_v18  ;;  %146 = vmatpush.msra.mxu1 %v131_v18 }
  0x21   :  { %199 = vmatpush.msra.mxu2 %v82_v15  ;;  %105 = vmatpush.msra.mxu0 %v82_v15 }
  0x22   :  { %214 = vmatpush.msra.mxu3 %v130_v20  ;;  %147 = vmatpush.msra.mxu1 %v130_v20 }
  0x23   :  { %200 = vmatpush.msra.mxu2 %v81_v17  ;;  %106 = vmatpush.msra.mxu0 %v81_v17 }
  0x24   :  { %215 = vmatpush.msra.mxu3 %v129_v22  ;;  %148 = vmatpush.msra.mxu1 %v129_v22 }
  0x25   :  { %201 = vmatpush.msra.mxu2 %v80_v19  ;;  %107 = vmatpush.msra.mxu0 %v80_v19 }
  0x26   :  { %216 = vmatpush.msra.mxu3 %v128_v24  ;;  %149 = vmatpush.msra.mxu1 %v128_v24 }
  0x27   :  { %202 = vmatpush.msra.mxu2 %v79_v21  ;;  %108 = vmatpush.msra.mxu0 %v79_v21 }
  0x28   :  { %217 = vmatpush.msra.mxu3 %v127_v26  ;;  %150 = vmatpush.msra.mxu1 %v127_v26 }
  0x29   :  { %203 = vmatpush.msra.mxu2 %v78_v23  ;;  %109 = vmatpush.msra.mxu0 %v78_v23 }
  0x2a   :  { %218 = vmatpush.msra.mxu3 %v126_v30  ;;  %151 = vmatpush.msra.mxu1 %v126_v30 }
  0x2b   :  { %204 = vmatpush.msra.mxu2 %v77_v25  ;;  %110 = vmatpush.msra.mxu0 %v77_v25 }
  0x2c   :  { %219 = vmatpush.msra.mxu3 %v125_v31  ;;  %152 = vmatpush.msra.mxu1 %v125_v31 }
  0x2d   :  { %205 = vmatpush.msra.mxu2 %v76_v27  ;;  %111 = vmatpush.msra.mxu0 %v76_v27 }
  0x2e   :  { %115 = vmatmul.f32.vlgmr.msra.gmra.mxu2 %v75_v28  ;;  %112 = vmatmul.f32.vlgmr.msra.gmra.mxu0 %v74_v29 }
  0x2f   :  { %220 = vmatpush.msra.mxu3 %v124_v32  ;;  %153 = vmatpush.msra.mxu1 %v124_v32 }
  0x31   :  { %221 = vmatpush.msra.mxu3 %v123_v33  ;;  %154 = vmatpush.msra.mxu1 %v123_v33 }
  0xab   :  { %v113_v35 = vpop.f32.mrf.mxu0 }
  0xac   :  { %v114_v36 = vadd.f32 %v228_v34, %v113_v35 }
  0xae   :  { %v119_v37 = vmax.f32 %v114_v36, 0.0 }
  0xb0   :  { %155 = vmatmul.f32.vlgmr.msra.gmra.mxu1 %v119_v37 }
  0xb1   :  { %v116_v38 = vpop.f32.mrf.mxu2 }
  0xb2   :  { %v117_v39 = vadd.f32 %v228_v34, %v116_v38 }
  0xb4   :  { %v120_v40 = vmax.f32 %v117_v39, 0.0 }
  0xb6   :  { %158 = vmatmul.f32.vlgmr.msra.gmra.mxu3 %v120_v40 }
 0x12d   :  { %v156_v42 = vpop.f32.mrf.mxu1 }
 0x12e   :  { %v162_v43 = vadd.f32 %v229_v41, %v156_v42 }
 0x130   :  { %168 = vst [vmem:[#allocation9] sm:$0xff] %v162_v43 }
 0x139   :  { %v159_v44 = vpop.f32.mrf.mxu3 }
 0x13a   :  { %v163_v45 = vadd.f32 %v229_v41, %v159_v44 }
 0x13c   :  { %169 = vst [vmem:[#allocation9 + $0x8] sm:$0xff] %v163_v45 }
 0x13d   :  { %182 = dma.vmem_to_hbm [thread:$0]  %s175_s12, 256, %s177_s2, [#allocation5], %s333_s26, %s333_s26, %s334_s27  }
 0x13e   :  { %330 = dma.done.wait [#allocation5], 256  }
 0x13f   :  { %331 = vsyncadd [#allocation5], 4294967040 }
 0x140   :  { %187 = vsyncpa [#allocation4], 1 }
 0x141   :  { %188 = vsyncpa [#allocation7], 1 }
 0x142   :  { %189 = vsyncpa [#allocation5], 1 }

// kernel: tpu_custom_call.1
= control target key start
LH: loop header
LB: loop body
LE: loop exit
PB: predicated region body
PF: predicated region fallthrough
CT: control target
= control target key end

     0   :  { %10 = vsyncpa [#allocation4], 0  ;;  %s405_s0 = inlined_call_operand.hbm [shape: f32[16,128], index: 0, kind: input, shape index: {}]   ;;  %s406_s1 = inlined_call_operand.hbm [shape: f32[128,128], index: 1, kind: input, shape index: {}]   ;;  %s407_s2 = inlined_call_operand.vmem [shape: f32[1,128], index: 2, kind: input, shape index: {}]   ;;  %s408_s3 = inlined_call_operand.hbm [shape: f32[128,128], index: 3, kind: input, shape index: {}]   ;;  %s409_s4 = inlined_call_operand.vmem [shape: f32[1,128], index: 4, kind: input, shape index: {}]   ;;  %s410_s5 = inlined_call_operand.hbm [shape: f32[16,128], index: 5, kind: output, shape index: {}]  }
   0x1   :  { %11 = vsyncpa [#allocation7], 0 }
   0x2   :  { %12 = vsyncpa [#allocation5], 0  ;;  %s30_s20 = sshll.u32 %s406_s1, 4  ;;  %s339_s21 = smov [#allocation6]   ;;  %s31_s20 = int_to_ptr.hbm [resolvable:$true] %s30_s20 }
   0x3   :  { %s32_s22 = sshll.u32 %s339_s21, 4  ;;  %s17_s25 = sshll.u32 %s405_s0, 4  ;;  %s33_s22 = int_to_ptr.vmem [resolvable:$true] %s32_s22  ;;  %s18_s25 = int_to_ptr.hbm [resolvable:$true] %s17_s25 }
   0x4   :  { %s340_s26 = smov 128   ;;  %s341_s27 = smov 8  }
   0x5   :  { %38 = dma.hbm_to_vmem [thread:$0]  %s31_s20, 2048, %s33_s22, [#allocation7], %s340_s26, %s340_s26, %s341_s27  }
   0x6   :  { %s342_s28 = smov [#allocation3]   ;;  %s45_s1 = sshll.u32 %s408_s3, 4  ;;  %s46_s1 = int_to_ptr.hbm [resolvable:$true] %s45_s1 }
   0x7   :  { %s19_s29 = sshll.u32 %s342_s28, 4  ;;  %s343_s0 = smov [#allocation8]   ;;  %s20_s29 = int_to_ptr.vmem [resolvable:$true] %s19_s29 }
   0x8   :  { %25 = dma.hbm_to_vmem [thread:$0]  %s18_s25, 256, %s20_s29, [#allocation4], %s340_s26, %s340_s26, %s341_s27  }
   0x9   :  { %s47_s7 = sshll.u32 %s343_s0, 4  ;;  %s48_s7 = int_to_ptr.vmem [resolvable:$true] %s47_s7 }
   0xa   :  { %53 = dma.hbm_to_vmem [thread:$0]  %s46_s1, 2048, %s48_s7, [#allocation7], %s340_s26, %s340_s26, %s341_s27  }
   0xb   :  { %333 = dma.done.wait [#allocation4], 256  }
   0xc   :  { %334 = vsyncadd [#allocation4], 4294967040 }
   0xd   :  { %335 = dma.done.wait [#allocation7], 4096  }
   0xe   :  { %336 = vsyncadd [#allocation7], 4294963200  ;;  %v95_v0 = vld [vmem:[#allocation6 + $0x78] sm:$0xff]  ;;  %v94_v1 = vld [vmem:[#allocation6 + $0x70] sm:$0xff]  ;;  %s344_s11 = smov [#allocation9]  }
   0xf   :  { %197 = vmatpush.msra.mxu2 %v95_v0  ;;  %100 = vmatpush.msra.mxu0 %v95_v0  ;;  %v93_v2 = vld [vmem:[#allocation6 + $0x68] sm:$0xff]  ;;  %v92_v3 = vld [vmem:[#allocation6 + $0x60] sm:$0xff]  ;;  %v91_v4 = vld [vmem:[#allocation6 + $0x58] sm:$0xff]  ;;  %s181_s12 = sshll.u32 %s344_s11, 4  ;;  %s182_s12 = int_to_ptr.vmem [resolvable:$true] %s181_s12 }
  0x10   :  { %v142_v5 = vld [vmem:[#allocation8 + $0x78] sm:$0xff]  ;;  %v141_v6 = vld [vmem:[#allocation8 + $0x70] sm:$0xff]  ;;  %v140_v8 = vld [vmem:[#allocation8 + $0x68] sm:$0xff] }
  0x11   :  { %198 = vmatpush.msra.mxu2 %v94_v1  ;;  %101 = vmatpush.msra.mxu0 %v94_v1  ;;  %v90_v7 = vld [vmem:[#allocation6 + $0x50] sm:$0xff]  ;;  %v89_v9 = vld [vmem:[#allocation6 + $0x48] sm:$0xff]  ;;  %v139_v10 = vld [vmem:[#allocation8 + $0x60] sm:$0xff] }
  0x12   :  { %213 = vmatpush.msra.mxu3 %v142_v5  ;;  %143 = vmatpush.msra.mxu1 %v142_v5  ;;  %v88_v11 = vld [vmem:[#allocation6 + $0x40] sm:$0xff]  ;;  %v138_v12 = vld [vmem:[#allocation8 + $0x58] sm:$0xff]  ;;  %v137_v14 = vld [vmem:[#allocation8 + $0x50] sm:$0xff] }
  0x13   :  { %199 = vmatpush.msra.mxu2 %v93_v2  ;;  %102 = vmatpush.msra.mxu0 %v93_v2  ;;  %v87_v13 = vld [vmem:[#allocation6 + $0x38] sm:$0xff]  ;;  %v86_v15 = vld [vmem:[#allocation6 + $0x30] sm:$0xff]  ;;  %v136_v16 = vld [vmem:[#allocation8 + $0x48] sm:$0xff] }
  0x14   :  { %214 = vmatpush.msra.mxu3 %v141_v6  ;;  %144 = vmatpush.msra.mxu1 %v141_v6  ;;  %v85_v17 = vld [vmem:[#allocation6 + $0x28] sm:$0xff]  ;;  %v135_v18 = vld [vmem:[#allocation8 + $0x40] sm:$0xff]  ;;  %v134_v20 = vld [vmem:[#allocation8 + $0x38] sm:$0xff] }
  0x15   :  { %200 = vmatpush.msra.mxu2 %v92_v3  ;;  %103 = vmatpush.msra.mxu0 %v92_v3  ;;  %v84_v19 = vld [vmem:[#allocation6 + $0x20] sm:$0xff]  ;;  %v83_v21 = vld [vmem:[#allocation6 + $0x18] sm:$0xff]  ;;  %v133_v22 = vld [vmem:[#allocation8 + $0x30] sm:$0xff] }
  0x16   :  { %215 = vmatpush.msra.mxu3 %v140_v8  ;;  %145 = vmatpush.msra.mxu1 %v140_v8  ;;  %v82_v23 = vld [vmem:[#allocation6 + $0x10] sm:$0xff]  ;;  %v132_v24 = vld [vmem:[#allocation8 + $0x28] sm:$0xff]  ;;  %v131_v26 = vld [vmem:[#allocation8 + $0x20] sm:$0xff] }
  0x17   :  { %201 = vmatpush.msra.mxu2 %v91_v4  ;;  %104 = vmatpush.msra.mxu0 %v91_v4  ;;  %v81_v25 = vld [vmem:[#allocation6 + $0x8] sm:$0xff]  ;;  %v80_v27 = vld [vmem:[#allocation6] sm:$0xff]  ;;  %v79_v28 = vld [vmem:[#allocation3 + $0x8] sm:$0xff] }
  0x18   :  { %216 = vmatpush.msra.mxu3 %v139_v10  ;;  %146 = vmatpush.msra.mxu1 %v139_v10  ;;  %v78_v29 = vld [vmem:[#allocation3] sm:$0xff]  ;;  %v130_v30 = vld [vmem:[#allocation8 + $0x18] sm:$0xff]  ;;  %v128_v32 = vld [vmem:[#allocation8 + $0x8] sm:$0xff] }
  0x19   :  { %202 = vmatpush.msra.mxu2 %v90_v7  ;;  %105 = vmatpush.msra.mxu0 %v90_v7  ;;  %v129_v31 = vld [vmem:[#allocation8 + $0x10] sm:$0xff]  ;;  %v127_v33 = vld [vmem:[#allocation8] sm:$0xff] }
  0x1a   :  { %217 = vmatpush.msra.mxu3 %v138_v12  ;;  %147 = vmatpush.msra.mxu1 %v138_v12  ;;  %v235_v34 = vld [vmem:[%s407_s2] ss:$0 sm:$0xff]  ;;  %s183_s2 = sshll.u32 %s410_s5, 4  ;;  %s184_s2 = int_to_ptr.hbm [resolvable:$true] %s183_s2 }
  0x1b   :  { %203 = vmatpush.msra.mxu2 %v89_v9  ;;  %106 = vmatpush.msra.mxu0 %v89_v9  ;;  %v236_v41 = vld [vmem:[%s409_s4] ss:$0 sm:$0xff] }
  0x1c   :  { %218 = vmatpush.msra.mxu3 %v137_v14  ;;  %148 = vmatpush.msra.mxu1 %v137_v14 }
  0x1d   :  { %204 = vmatpush.msra.mxu2 %v88_v11  ;;  %107 = vmatpush.msra.mxu0 %v88_v11 }
  0x1e   :  { %219 = vmatpush.msra.mxu3 %v136_v16  ;;  %149 = vmatpush.msra.mxu1 %v136_v16 }
  0x1f   :  { %205 = vmatpush.msra.mxu2 %v87_v13  ;;  %108 = vmatpush.msra.mxu0 %v87_v13 }
  0x20   :  { %220 = vmatpush.msra.mxu3 %v135_v18  ;;  %150 = vmatpush.msra.mxu1 %v135_v18 }
  0x21   :  { %206 = vmatpush.msra.mxu2 %v86_v15  ;;  %109 = vmatpush.msra.mxu0 %v86_v15 }
  0x22   :  { %221 = vmatpush.msra.mxu3 %v134_v20  ;;  %151 = vmatpush.msra.mxu1 %v134_v20 }
  0x23   :  { %207 = vmatpush.msra.mxu2 %v85_v17  ;;  %110 = vmatpush.msra.mxu0 %v85_v17 }
  0x24   :  { %222 = vmatpush.msra.mxu3 %v133_v22  ;;  %152 = vmatpush.msra.mxu1 %v133_v22 }
  0x25   :  { %208 = vmatpush.msra.mxu2 %v84_v19  ;;  %111 = vmatpush.msra.mxu0 %v84_v19 }
  0x26   :  { %223 = vmatpush.msra.mxu3 %v132_v24  ;;  %153 = vmatpush.msra.mxu1 %v132_v24 }
  0x27   :  { %209 = vmatpush.msra.mxu2 %v83_v21  ;;  %112 = vmatpush.msra.mxu0 %v83_v21 }
  0x28   :  { %224 = vmatpush.msra.mxu3 %v131_v26  ;;  %154 = vmatpush.msra.mxu1 %v131_v26 }
  0x29   :  { %210 = vmatpush.msra.mxu2 %v82_v23  ;;  %113 = vmatpush.msra.mxu0 %v82_v23 }
  0x2a   :  { %225 = vmatpush.msra.mxu3 %v130_v30  ;;  %155 = vmatpush.msra.mxu1 %v130_v30 }
  0x2b   :  { %211 = vmatpush.msra.mxu2 %v81_v25  ;;  %114 = vmatpush.msra.mxu0 %v81_v25 }
  0x2c   :  { %226 = vmatpush.msra.mxu3 %v129_v31  ;;  %156 = vmatpush.msra.mxu1 %v129_v31 }
  0x2d   :  { %212 = vmatpush.msra.mxu2 %v80_v27  ;;  %115 = vmatpush.msra.mxu0 %v80_v27 }
  0x2e   :  { %119 = vmatmul.f32.vlgmr.msra.gmra.mxu2 %v79_v28  ;;  %116 = vmatmul.f32.vlgmr.msra.gmra.mxu0 %v78_v29 }
  0x2f   :  { %227 = vmatpush.msra.mxu3 %v128_v32  ;;  %157 = vmatpush.msra.mxu1 %v128_v32 }
  0x31   :  { %228 = vmatpush.msra.mxu3 %v127_v33  ;;  %158 = vmatpush.msra.mxu1 %v127_v33 }
  0xab   :  { %v117_v35 = vpop.f32.mrf.mxu0 }
  0xac   :  { %v118_v36 = vadd.f32 %v235_v34, %v117_v35 }
  0xae   :  { %v123_v37 = vmax.f32 %v118_v36, 0.0 }
  0xb0   :  { %159 = vmatmul.f32.vlgmr.msra.gmra.mxu1 %v123_v37 }
  0xb1   :  { %v120_v38 = vpop.f32.mrf.mxu2 }
  0xb2   :  { %v121_v39 = vadd.f32 %v235_v34, %v120_v38 }
  0xb4   :  { %v124_v40 = vmax.f32 %v121_v39, 0.0 }
  0xb6   :  { %162 = vmatmul.f32.vlgmr.msra.gmra.mxu3 %v124_v40 }
 0x12d   :  { %v160_v42 = vpop.f32.mrf.mxu1 }
 0x12e   :  { %v166_v43 = vadd.f32 %v236_v41, %v160_v42 }
 0x130   :  { %175 = vst [vmem:[#allocation9] sm:$0xff] %v166_v43 }
 0x139   :  { %v163_v44 = vpop.f32.mrf.mxu3 }
 0x13a   :  { %v167_v45 = vadd.f32 %v236_v41, %v163_v44 }
 0x13c   :  { %176 = vst [vmem:[#allocation9 + $0x8] sm:$0xff] %v167_v45 }
 0x13d   :  { %189 = dma.vmem_to_hbm [thread:$0]  %s182_s12, 256, %s184_s2, [#allocation5], %s340_s26, %s340_s26, %s341_s27  }
 0x13e   :  { %337 = dma.done.wait [#allocation5], 256  }
 0x13f   :  { %338 = vsyncadd [#allocation5], 4294967040 }
 0x140   :  { %194 = vsyncpa [#allocation4], 1 }
 0x141   :  { %195 = vsyncpa [#allocation7], 1 }
 0x142   :  { %196 = vsyncpa [#allocation5], 1 }

</bundles_post_ra>
